<compile_context>
chip_gen: v7x
topology: tpu7x:2x2x1
jax: 0.10.0
libtpu: 0.0.40
codegen_flags: <defaults>
</compile_context>

<pallas_src>
import jax
import jax.numpy as jnp
from jax.experimental import pallas as pl
from jax.experimental.pallas import tpu as pltpu


# ----------------------------------------------------------------------------
# Plain-JAX helpers (wrapper / trace-time)
# ----------------------------------------------------------------------------
def _bicubic_matrix(in_size, out_size, dtype=jnp.float32):
    """(out_size, in_size) PyTorch bicubic weights, align_corners=True.

    Keys cubic kernel with A=-0.75, tap indices clamped to [0, in_size-1]
    (matches aten::upsample_bicubic2d).  Each row sums to exactly 1.
    """
    a = -0.75
    if out_size == 1:
        src = jnp.zeros((1,), jnp.float32)
    else:
        src = jnp.arange(out_size, dtype=jnp.float32) * ((in_size - 1) / (out_size - 1))
    x0f = jnp.floor(src)
    t = src - x0f
    x0 = x0f.astype(jnp.int32)

    def cub1(s):  # |s| <= 1
        return ((a + 2.0) * s - (a + 3.0)) * s * s + 1.0

    def cub2(s):  # 1 < |s| < 2
        return ((a * s - 5.0 * a) * s + 8.0 * a) * s - 4.0 * a

    w = jnp.stack([cub2(t + 1.0), cub1(t), cub1(1.0 - t), cub2(2.0 - t)], axis=1)
    idx = jnp.clip(jnp.stack([x0 - 1, x0, x0 + 1, x0 + 2], axis=1), 0, in_size - 1)
    m = jnp.zeros((out_size, in_size), jnp.float32)
    m = m.at[jnp.arange(out_size)[:, None], idx].add(w)
    return m.astype(dtype)


def _spectral_conv2d_cl(x, w1, w2, dim1, dim2, modes1, modes2):
    """SpectralConv2d_Uno.forward, emitted channel-last (N, dim1, dim2, C_out).

    # TODO(synk): no Pallas FFT primitive -> plain JAX (XLA) glue.
    """
    n = x.shape[0]
    c_out = w1.shape[1]
    x_ft = jnp.fft.rfft2(x.astype(jnp.float32), norm="forward")   # (N, Ci, H, W//2+1)
    top = jnp.einsum("bixy,ioxy->bxyo", x_ft[:, :, :modes1, :modes2], w1)
    bot = jnp.einsum("bixy,ioxy->bxyo", x_ft[:, :, -modes1:, :modes2], w2)
    out_ft = jnp.zeros((n, dim1, dim2 // 2 + 1, c_out), dtype=jnp.complex64)
    out_ft = out_ft.at[:, :modes1, :modes2, :].set(top)
    out_ft = out_ft.at[:, dim1 - modes1:, :modes2, :].set(bot)
    # irfft over the two spatial axes -> float32 channel-last result.
    return jnp.fft.irfftn(out_ft, s=(dim1, dim2), axes=(1, 2), norm="forward")


_SQRT_2_OVER_PI = 0.7978845608028654


def _gelu_tanh(v):
    # TODO(synk): PyTorch F.gelu default is the exact erf form; the tanh
    # approximation (<=~1e-3 abs diff) is used for guaranteed Mosaic lowering.
    return 0.5 * v * (1.0 + jnp.tanh(_SQRT_2_OVER_PI * (v + 0.044715 * v * v * v)))


# ----------------------------------------------------------------------------
# Fused Pallas kernel: 1x1 conv + bicubic resize + residual add + bias + GELU
# ----------------------------------------------------------------------------
def _fused_block_kernel(x_ref, spec_ref, a_ref, k_ref, bias_ref, o_ref):
    # x_ref:    (nb*H,    C_in*W)      input tile, channels folded with W
    # spec_ref: (nb*dim1, dim2*C_out)  spectral branch (f32, channel-last flat)
    # a_ref:    (nb*dim1, nb*H)        block-diagonal bicubic-H interp (f32)
    # k_ref:    (C_in*W,  dim2*C_out)  fused [1x1-conv (x) bicubic-W] matrix
    # bias_ref: (1,       dim2*C_out)  conv bias tiled over dim2 (f32)
    # o_ref:    (nb*dim1, dim2*C_out)  lane-dense output
    z = jnp.dot(x_ref[...], k_ref[...], preferred_element_type=jnp.float32)
    y = jnp.dot(a_ref[...], z, preferred_element_type=jnp.float32)
    y = y + bias_ref[...] + spec_ref[...]            # one slab-wide epilogue
    o_ref[...] = _gelu_tanh(y).astype(o_ref.dtype)


# ----------------------------------------------------------------------------
# Tiling heuristics
# ----------------------------------------------------------------------------
def _vmem_capacity_bytes():
    try:
        return int(pltpu.get_tpu_info().vmem_capacity_bytes)
    except Exception:
        return 64 * 2**20          # conservative (v7x per-TC size)


def _num_tensorcores():
    try:
        return max(1, int(getattr(jax.devices()[0], "num_cores", 1)))
    except Exception:
        return 1


def _block_vmem_bytes(nb, h, ciw, dim1, ncol, cdt_bytes, out_bytes):
    x_blk = nb * h * ciw * cdt_bytes
    spec_blk = nb * dim1 * ncol * 4
    out_blk = nb * dim1 * ncol * out_bytes
    a_blk = (nb * dim1) * (nb * h) * 4
    k_blk = ciw * ncol * cdt_bytes
    bias_blk = ncol * 4
    # everything conservatively counted double-buffered
    return 2 * (x_blk + spec_blk + out_blk + a_blk + k_blk + bias_blk)


def _pick_batch_tile(n, fits, num_cores, max_nb=8):
    divisors = [d for d in range(1, min(n, max_nb) + 1) if n % d == 0]
    fitting = [d for d in divisors if fits(d)] or [1]
    if num_cores > 1:
        balanced = [d for d in fitting if (n // d) % num_cores == 0]
        if balanced:
            return max(balanced)
    return max(fitting)


# ----------------------------------------------------------------------------
# Public wrapper
# ----------------------------------------------------------------------------
def operator_block_2d(x, spec_w1, spec_w2, conv_w, conv_b, dim1, dim2,
                      modes1, modes2, batch_tile=None, channels_last_output=False):
    """OperatorBlock_2D.forward (Normalize=False, Non_Lin=True).

    x: (N, C_in, H, W) -> (N, C_out, dim1, dim2)   (or NHWC if channels_last_output)
    """
    n, c_in, h, w = x.shape
    c_out = conv_w.shape[0]
    cdt = x.dtype                         # streamed compute dtype follows input
    ciw = c_in * w
    ncol = dim2 * c_out

    # ---- spectral branch: channel-last, no extra HBM transpose --------------
    spec_cl = _spectral_conv2d_cl(x, spec_w1, spec_w2, dim1, dim2, modes1, modes2)
    spec_flat = spec_cl.reshape(n * dim1, ncol)                 # f32, free reshape

    # ---- wrapper-side operand construction (cheap, trace-time-ish) ----------
    a_mat = _bicubic_matrix(h, dim1)                            # (dim1, H) f32
    b_mat = _bicubic_matrix(w, dim2)                            # (dim2, W) f32
    w2d = conv_w.reshape(c_out, c_in).astype(jnp.float32)
    # K[c*W + w, j*C_out + o] = conv_w[o, c] * B[j, w]
    k_mat = jnp.einsum("oc,jw->cwjo", w2d, b_mat).reshape(ciw, ncol).astype(cdt)
    bias_row = jnp.tile(conv_b.astype(jnp.float32), dim2)[None, :]   # (1, ncol)

    # x presented as a 2-D (N*H, C_in*W) slab: pure view of (N,H,C,W)
    x_flat = jnp.transpose(x, (0, 2, 1, 3)).reshape(n * h, ciw)

    # ---- batch tile & VMEM budget (generation-aware) ------------------------
    out_bytes = jnp.dtype(cdt).itemsize
    cdt_bytes = jnp.dtype(cdt).itemsize
    budget = int(0.75 * _vmem_capacity_bytes())

    def fits(nb):
        return _block_vmem_bytes(nb, h, ciw, dim1, ncol, cdt_bytes, out_bytes) <= budget

    if batch_tile is not None:
        nb = batch_tile
        assert n % nb == 0, "batch tile must divide the batch size"
    else:
        nb = _pick_batch_tile(n, fits, _num_tensorcores())
    grid = (n // nb,)

    # block-diagonal H-interp so the second GEMM is batch-fused too
    a_blk = jnp.kron(jnp.eye(nb, dtype=jnp.float32), a_mat)     # (nb*dim1, nb*H)

    need = _block_vmem_bytes(nb, h, ciw, dim1, ncol, cdt_bytes, out_bytes)
    vmem_limit = int(min(budget, max(16 * 2**20, 2 * need)))

    flops_step = (2 * (nb * h) * ciw * ncol          # Xblk @ K
                  + 2 * (nb * dim1) * (nb * h) * ncol  # Ablk @ Z
                  + 4 * nb * dim1 * ncol)              # epilogue
    cost = pl.CostEstimate(
        flops=int(flops_step * grid[0]),
        transcendentals=int(n * dim1 * ncol),
        bytes_accessed=int(x_flat.size * cdt_bytes
                           + spec_flat.size * 4
                           + a_blk.size * 4 + k_mat.size * cdt_bytes + bias_row.size * 4
                           + n * dim1 * ncol * out_bytes),
    )

    out_flat = pl.pallas_call(
        _fused_block_kernel,
        out_shape=jax.ShapeDtypeStruct((n * dim1, ncol), cdt),
        grid=grid,
        in_specs=[
            pl.BlockSpec((nb * h, ciw), lambda g: (g, 0)),
            pl.BlockSpec((nb * dim1, ncol), lambda g: (g, 0)),
            pl.BlockSpec((nb * dim1, nb * h), lambda g: (0, 0)),
            pl.BlockSpec((ciw, ncol), lambda g: (0, 0)),
            pl.BlockSpec((1, ncol), lambda g: (0, 0)),
        ],
        out_specs=pl.BlockSpec((nb * dim1, ncol), lambda g: (g, 0)),
        compiler_params=pltpu.CompilerParams(
            dimension_semantics=("parallel",),
            vmem_limit_bytes=vmem_limit,
        ),
        cost_estimate=cost,
    )(x_flat, spec_flat, a_blk, k_mat, bias_row)

    out_nhwc = out_flat.reshape(n, dim1, dim2, c_out)
    if channels_last_output:
        return out_nhwc                   # chainable layout, no HBM transpose
    # TODO(synk): module contract is NCHW; in a full UNO stack keep channel-last.
    return out_nhwc.transpose(0, 3, 1, 2)


# ----------------------------------------------------------------------------
# Demo / self-check
# ----------------------------------------------------------------------------
if __name__ == "__main__":
    N, in_codim, out_codim = 2, 4, 8
    H = W = 16
    dim1 = dim2 = 32
    modes1 = modes2 = 6          # <= min(dim/2, input_dim/2)

    key = jax.random.PRNGKey(0)
    kx, kw, kb, k1r, k1i, k2r, k2i = jax.random.split(key, 7)

    x = jax.random.normal(kx, (N, in_codim, H, W), dtype=jnp.float32)

    bound = (1.0 / in_codim) ** 0.5          # PyTorch Conv2d(k=1) default init
    conv_w = jax.random.uniform(kw, (out_codim, in_codim, 1, 1),
                                minval=-bound, maxval=bound, dtype=jnp.float32)
    conv_b = jax.random.uniform(kb, (out_codim,),
                                minval=-bound, maxval=bound, dtype=jnp.float32)

    scale = (1.0 / (2 * in_codim)) ** 0.5
    w1 = (scale * (jax.random.normal(k1r, (in_codim, out_codim, modes1, modes2))
                   + 1j * jax.random.normal(k1i, (in_codim, out_codim, modes1, modes2))
                   )).astype(jnp.complex64)
    w2 = (scale * (jax.random.normal(k2r, (in_codim, out_codim, modes1, modes2))
                   + 1j * jax.random.normal(k2i, (in_codim, out_codim, modes1, modes2))
                   )).astype(jnp.complex64)

    fwd = jax.jit(lambda xx: operator_block_2d(xx, w1, w2, conv_w, conv_b,
                                               dim1, dim2, modes1, modes2))
    out = jax.block_until_ready(fwd(x))
    assert out.shape == (N, out_codim, dim1, dim2)

    # Pure-JAX reference of the whole forward in the ORIGINAL operation order
    # (1x1 conv -> +bias -> bicubic resize, spectral branch, add, GELU).
    x1_ref = _spectral_conv2d_cl(x, w1, w2, dim1, dim2,
                                 modes1, modes2).transpose(0, 3, 1, 2)
    a_ref = _bicubic_matrix(H, dim1)
    b_ref = _bicubic_matrix(W, dim2)
    wt = conv_w.reshape(out_codim, in_codim)
    y_ref = jnp.einsum("oc,nchw->nohw", wt, x) + conv_b[None, :, None, None]
    x2_ref = jnp.einsum("ih,nohw,jw->noij", a_ref, y_ref, b_ref)
    ref = _gelu_tanh(x1_ref + x2_ref)

    assert jnp.allclose(out, ref, atol=5e-3, rtol=5e-3), \
        float(jnp.max(jnp.abs(out - ref)))

    print("KERNEL_OK")
</pallas_src>

<mosaic_0001>
module attributes {stable_mosaic.version = 11 : i64} {
  func.func private @main(%arg0: i32) attributes {dimension_semantics = [#tpu.dimension_semantics<core_parallel>], iteration_bounds = array<i64: 2>, tpu.core_type = #tpu.core_type<sc_scalar_subcore>, window_params = []} {
    return
  }
}

module attributes {stable_mosaic.version = 11 : i64} {
  func.func private @main(%arg0: i32) attributes {dimension_semantics = [#tpu.dimension_semantics<core_parallel>], iteration_bounds = array<i64: 2>, tpu.core_type = #tpu.core_type<sc_scalar_subcore>, window_params = []} {
    return
  }
}

module attributes {stable_mosaic.version = 11 : i64} {
  func.func @_fused_block_kernel(%arg0: i32, %arg1: memref<32x64xf32, #tpu.memory_space<vmem>>, %arg2: memref<64x256xf32, #tpu.memory_space<vmem>>, %arg3: memref<64x32xf32, #tpu.memory_space<vmem>>, %arg4: memref<64x256xf32, #tpu.memory_space<vmem>>, %arg5: memref<1x256xf32, #tpu.memory_space<vmem>>, %arg6: memref<64x256xf32, #tpu.memory_space<vmem>>) attributes {dimension_semantics = [#tpu.dimension_semantics<parallel>], iteration_bounds = array<i64: 1>, scalar_prefetch = 0 : i64, scratch_operands = 0 : i64, tpu.core_type = #tpu.core_type<tc>, window_params = [{transform_indices = @transform_0, window_bounds = array<i64: 32, 64>}, {transform_indices = @transform_1, window_bounds = array<i64: 64, 256>}, {pipeline_mode = #tpu.pipeline_mode<synchronous>, transform_indices = @transform_2, window_bounds = array<i64: 64, 32>}, {pipeline_mode = #tpu.pipeline_mode<synchronous>, transform_indices = @transform_3, window_bounds = array<i64: 64, 256>}, {pipeline_mode = #tpu.pipeline_mode<synchronous>, transform_indices = @transform_4, window_bounds = array<i64: 1, 256>}, {transform_indices = @transform_5, window_bounds = array<i64: 64, 256>}]} {
    %c0 = arith.constant 0 : index
    %c0_0 = arith.constant 0 : index
    %0 = vector.load %arg1[%c0, %c0_0] : memref<32x64xf32, #tpu.memory_space<vmem>>, vector<32x64xf32>
    %c0_1 = arith.constant 0 : index
    %c0_2 = arith.constant 0 : index
    %1 = vector.load %arg4[%c0_1, %c0_2] : memref<64x256xf32, #tpu.memory_space<vmem>>, vector<64x256xf32>
    %cst = arith.constant dense<0.000000e+00> : vector<32x256xf32>
    %2 = tpu.matmul %0, %1, %cst {dimension_numbers = #tpu.dot_dimension_numbers<[1], [0], [0], [1], [0, 0, 1, 1], [], []>} : vector<32x64xf32>, vector<64x256xf32>, vector<32x256xf32> -> vector<32x256xf32>
    %c0_3 = arith.constant 0 : index
    %c0_4 = arith.constant 0 : index
    %3 = vector.load %arg3[%c0_3, %c0_4] : memref<64x32xf32, #tpu.memory_space<vmem>>, vector<64x32xf32>
    %cst_5 = arith.constant dense<0.000000e+00> : vector<64x256xf32>
    %4 = tpu.matmul %3, %2, %cst_5 {dimension_numbers = #tpu.dot_dimension_numbers<[1], [0], [0], [1], [0, 0, 1, 1], [], []>} : vector<64x32xf32>, vector<32x256xf32>, vector<64x256xf32> -> vector<64x256xf32>
    %c0_6 = arith.constant 0 : index
    %c0_7 = arith.constant 0 : index
    %5 = vector.load %arg5[%c0_6, %c0_7] : memref<1x256xf32, #tpu.memory_space<vmem>>, vector<1x256xf32>
    %6 = vector.broadcast %5 : vector<1x256xf32> to vector<64x256xf32>
    %7 = arith.addf %4, %6 : vector<64x256xf32>
    %c0_8 = arith.constant 0 : index
    %c0_9 = arith.constant 0 : index
    %8 = vector.load %arg2[%c0_8, %c0_9] : memref<64x256xf32, #tpu.memory_space<vmem>>, vector<64x256xf32>
    %9 = arith.addf %7, %8 : vector<64x256xf32>
    %cst_10 = arith.constant 5.000000e-01 : f32
    %10 = vector.broadcast %cst_10 : f32 to vector<64x256xf32>
    %11 = arith.mulf %10, %9 : vector<64x256xf32>
    %cst_11 = arith.constant 4.471500e-02 : f32
    %12 = vector.broadcast %cst_11 : f32 to vector<64x256xf32>
    %13 = arith.mulf %12, %9 : vector<64x256xf32>
    %14 = arith.mulf %13, %9 : vector<64x256xf32>
    %15 = arith.mulf %14, %9 : vector<64x256xf32>
    %16 = arith.addf %9, %15 : vector<64x256xf32>
    %cst_12 = arith.constant 0.797884583 : f32
    %17 = vector.broadcast %cst_12 : f32 to vector<64x256xf32>
    %18 = arith.mulf %17, %16 : vector<64x256xf32>
    %19 = math.tanh %18 : vector<64x256xf32>
    %cst_13 = arith.constant 1.000000e+00 : f32
    %20 = vector.broadcast %cst_13 : f32 to vector<64x256xf32>
    %21 = arith.addf %20, %19 : vector<64x256xf32>
    %22 = arith.mulf %11, %21 : vector<64x256xf32>
    %c0_14 = arith.constant 0 : index
    %c0_15 = arith.constant 0 : index
    %23 = vector.load %arg6[%c0_14, %c0_15] : memref<64x256xf32, #tpu.memory_space<vmem>>, vector<64x256xf32>
    tpu.vector_store %arg6[%c0_14, %c0_15], %22 {strides = array<i32>} : memref<64x256xf32, #tpu.memory_space<vmem>>, vector<64x256xf32>,
    return
  }
  func.func @transform_0(%arg0: i32) -> (i32, i32) {
    %c0_i32 = arith.constant 0 : i32
    %c0_i32_0 = arith.constant 0 : i32
    return %arg0, %c0_i32 : i32, i32
  }
  func.func @transform_1(%arg0: i32) -> (i32, i32) {
    %c0_i32 = arith.constant 0 : i32
    %c0_i32_0 = arith.constant 0 : i32
    return %arg0, %c0_i32 : i32, i32
  }
  func.func @transform_2(%arg0: i32) -> (i32, i32) {
    %c0_i32 = arith.constant 0 : i32
    %c0_i32_0 = arith.constant 0 : i32
    %c0_i32_1 = arith.constant 0 : i32
    return %c0_i32, %c0_i32_0 : i32, i32
  }
  func.func @transform_3(%arg0: i32) -> (i32, i32) {
    %c0_i32 = arith.constant 0 : i32
    %c0_i32_0 = arith.constant 0 : i32
    %c0_i32_1 = arith.constant 0 : i32
    return %c0_i32, %c0_i32_0 : i32, i32
  }
  func.func @transform_4(%arg0: i32) -> (i32, i32) {
    %c0_i32 = arith.constant 0 : i32
    %c0_i32_0 = arith.constant 0 : i32
    %c0_i32_1 = arith.constant 0 : i32
    return %c0_i32, %c0_i32_0 : i32, i32
  }
  func.func @transform_5(%arg0: i32) -> (i32, i32) {
    %c0_i32 = arith.constant 0 : i32
    %c0_i32_0 = arith.constant 0 : i32
    return %arg0, %c0_i32 : i32, i32
  }
}

</mosaic_0001>

<bundles_post_ra>
// kernel: reverse.0
= control target key start
LH: loop header
LB: loop body
LE: loop exit
PB: predicated region body
PF: predicated region fallthrough
CT: control target
= control target key end

     0   :  { %v168_v12 = vlaneseq  ;;  %v174_v37 = vld [vmem:[#allocation0 + $0x7] ss:$-1 sm:$0xff]  ;;  %v202_v45 = vld [vmem:[#allocation0 + $0x1f] ss:$-1 sm:$0xff]  ;;  %v230_v53 = vld [vmem:[#allocation0 + $0x37] ss:$-1 sm:$0xff]  ;;  %s1161_s0 = inlined_call_operand.vmem [shape: f32[2,8,32,15], index: 0, kind: input, shape index: {}]   ;;  %s1162_s1 = inlined_call_operand.vmem [shape: f32[2,8,32,15], index: 1, kind: output, shape index: {}]  }
   0x1   :  { %v92_v0 = vld [vmem:[%s1161_s0] sm:$0xff]  ;;  %v94_v1 = vld [vmem:[%s1161_s0 + $0x8] sm:$0xff]  ;;  %v96_v2 = vld [vmem:[%s1161_s0 + $0x10] sm:$0xff]  ;;  %v175_v39 = vrot.slane %v174_v37, 1  ;;  %v203_v47 = vrot.slane %v202_v45, 1  ;;  %v231_v55 = vrot.slane %v230_v53, 1 }
   0x2   :  { %93 = vst [vmem:[#allocation0 + $0x8] sm:$0xff] %v92_v0  ;;  %95 = vst [vmem:[#allocation0 + $0x10] sm:$0xff] %v94_v1  ;;  %v98_v3 = vld [vmem:[%s1161_s0 + $0x18] sm:$0xff]  ;;  %v100_v4 = vld [vmem:[%s1161_s0 + $0x20] sm:$0xff]  ;;  %v974_v25 = vshrl.u32 %v168_v12, 7 }
   0x3   :  { %97 = vst [vmem:[#allocation0 + $0x20] sm:$0xff] %v96_v2  ;;  %v102_v5 = vld [vmem:[%s1161_s0 + $0x28] sm:$0xff]  ;;  %99 = vst [vmem:[#allocation0 + $0x28] sm:$0xff] %v98_v3  ;;  %v104_v6 = vld [vmem:[%s1161_s0 + $0x30] sm:$0xff] }
   0x4   :  { %101 = vst [vmem:[#allocation0 + $0x38] sm:$0xff] %v100_v4  ;;  %103 = vst [vmem:[#allocation0 + $0x40] sm:$0xff] %v102_v5  ;;  %v106_v7 = vld [vmem:[%s1161_s0 + $0x38] sm:$0xff]  ;;  %v108_v8 = vld [vmem:[%s1161_s0 + $0x40] sm:$0xff]  ;;  %vm170_vm0 = vcmp.lt.s32.totalorder %v974_v25, 7 }
   0x5   :  { %105 = vst [vmem:[#allocation0 + $0x50] sm:$0xff] %v104_v6  ;;  %107 = vst [vmem:[#allocation0 + $0x58] sm:$0xff] %v106_v7  ;;  %v110_v9 = vld [vmem:[%s1161_s0 + $0x48] sm:$0xff]  ;;  %v112_v10 = vld [vmem:[%s1161_s0 + $0x50] sm:$0xff] }
   0x6   :  { %109 = vst [vmem:[#allocation0 + $0x68] sm:$0xff] %v108_v8  ;;  %v114_v11 = vld [vmem:[%s1161_s0 + $0x58] sm:$0xff]  ;;  %111 = vst [vmem:[#allocation0 + $0x70] sm:$0xff] %v110_v9  ;;  %v116_v13 = vld [vmem:[%s1161_s0 + $0x60] sm:$0xff] }
   0x7   :  { %113 = vst [vmem:[#allocation0 + $0x80] sm:$0xff] %v112_v10  ;;  %115 = vst [vmem:[#allocation0 + $0x88] sm:$0xff] %v114_v11  ;;  %v118_v14 = vld [vmem:[%s1161_s0 + $0x68] sm:$0xff]  ;;  %v120_v15 = vld [vmem:[%s1161_s0 + $0x70] sm:$0xff] }
   0x8   :  { %117 = vst [vmem:[#allocation0 + $0x98] sm:$0xff] %v116_v13  ;;  %119 = vst [vmem:[#allocation0 + $0xa0] sm:$0xff] %v118_v14  ;;  %v122_v16 = vld [vmem:[%s1161_s0 + $0x78] sm:$0xff]  ;;  %v124_v17 = vld [vmem:[%s1161_s0 + $0x80] sm:$0xff] }
   0x9   :  { %121 = vst [vmem:[#allocation0 + $0xb0] sm:$0xff] %v120_v15  ;;  %v126_v18 = vld [vmem:[%s1161_s0 + $0x88] sm:$0xff]  ;;  %123 = vst [vmem:[#allocation0 + $0xb8] sm:$0xff] %v122_v16  ;;  %v128_v19 = vld [vmem:[%s1161_s0 + $0x90] sm:$0xff] }
   0xa   :  { %125 = vst [vmem:[#allocation0 + $0xc8] sm:$0xff] %v124_v17  ;;  %127 = vst [vmem:[#allocation0 + $0xd0] sm:$0xff] %v126_v18  ;;  %v130_v20 = vld [vmem:[%s1161_s0 + $0x98] sm:$0xff]  ;;  %v132_v21 = vld [vmem:[%s1161_s0 + $0xa0] sm:$0xff] }
   0xb   :  { %129 = vst [vmem:[#allocation0 + $0xe0] sm:$0xff] %v128_v19  ;;  %131 = vst [vmem:[#allocation0 + $0xe8] sm:$0xff] %v130_v20  ;;  %v134_v22 = vld [vmem:[%s1161_s0 + $0xa8] sm:$0xff]  ;;  %v136_v23 = vld [vmem:[%s1161_s0 + $0xb0] sm:$0xff] }
   0xc   :  { %133 = vst [vmem:[#allocation0 + $0xf8] sm:$0xff] %v132_v21  ;;  %v138_v24 = vld [vmem:[%s1161_s0 + $0xb8] sm:$0xff]  ;;  %135 = vst [vmem:[#allocation0 + $0x100] sm:$0xff] %v134_v22  ;;  %v140_v26 = vld [vmem:[%s1161_s0 + $0xc0] sm:$0xff] }
   0xd   :  { %137 = vst [vmem:[#allocation0 + $0x110] sm:$0xff] %v136_v23  ;;  %139 = vst [vmem:[#allocation0 + $0x118] sm:$0xff] %v138_v24  ;;  %v142_v27 = vld [vmem:[%s1161_s0 + $0xc8] sm:$0xff]  ;;  %v144_v28 = vld [vmem:[%s1161_s0 + $0xd0] sm:$0xff] }
   0xe   :  { %141 = vst [vmem:[#allocation0 + $0x128] sm:$0xff] %v140_v26  ;;  %143 = vst [vmem:[#allocation0 + $0x130] sm:$0xff] %v142_v27  ;;  %v146_v29 = vld [vmem:[%s1161_s0 + $0xd8] sm:$0xff]  ;;  %v148_v30 = vld [vmem:[%s1161_s0 + $0xe0] sm:$0xff] }
   0xf   :  { %145 = vst [vmem:[#allocation0 + $0x140] sm:$0xff] %v144_v28  ;;  %v150_v31 = vld [vmem:[%s1161_s0 + $0xe8] sm:$0xff]  ;;  %147 = vst [vmem:[#allocation0 + $0x148] sm:$0xff] %v146_v29  ;;  %v152_v32 = vld [vmem:[%s1161_s0 + $0xf0] sm:$0xff] }
  0x10   :  { %149 = vst [vmem:[#allocation0 + $0x158] sm:$0xff] %v148_v30  ;;  %151 = vst [vmem:[#allocation0 + $0x160] sm:$0xff] %v150_v31  ;;  %v154_v33 = vld [vmem:[%s1161_s0 + $0xf8] sm:$0xff]  ;;  %v161_v34 = vld [vmem:[#allocation0 + $0xf] ss:$-1 sm:$0xff] }
  0x11   :  { %153 = vst [vmem:[#allocation0 + $0x170] sm:$0xff] %v152_v32  ;;  %155 = vst [vmem:[#allocation0 + $0x178] sm:$0xff] %v154_v33  ;;  %v162_v35 = vrot.slane %v161_v34, 1  ;;  %v166_v36 = vld [vmem:[#allocation0 + $0x17] ss:$-1 sm:$0xff] }
  0x12   :  { %v167_v38 = vrot.slane %v166_v36, 1  ;;  %v179_v40 = vld [vmem:[#allocation0 + $0xf] ss:$-1 sm:$0xff]  ;;  %v189_v41 = vld [vmem:[#allocation0 + $0x27] ss:$-1 sm:$0xff]  ;;  %176 = vst [vmem:[#allocation1 + $0x8] sm:$0xff] %v175_v39 }
  0x13   :  { %163 = vst [vmem:[#allocation1] sm:$0xff] %v162_v35  ;;  %v180_v42 = vrot.slane %v179_v40, 1  ;;  %v190_v43 = vrot.slane %v189_v41, 1  ;;  %v194_v44 = vld [vmem:[#allocation0 + $0x2f] ss:$-1 sm:$0xff]  ;;  %204 = vst [vmem:[#allocation1 + $0x18] sm:$0xff] %v203_v47 }
  0x14   :  { %171 = vst.msk [vmem:[#allocation1] sm:$0xff] %vm170_vm0, %v167_v38  ;;  %v195_v46 = vrot.slane %v194_v44, 1  ;;  %v207_v48 = vld [vmem:[#allocation0 + $0x27] ss:$-1 sm:$0xff]  ;;  %v217_v49 = vld [vmem:[#allocation0 + $0x3f] ss:$-1 sm:$0xff] }
  0x15   :  { %184 = vst.msk [vmem:[#allocation1 + $0x8] sm:$0xff] %vm170_vm0, %v180_v42  ;;  %191 = vst [vmem:[#allocation1 + $0x10] sm:$0xff] %v190_v43  ;;  %v208_v50 = vrot.slane %v207_v48, 1  ;;  %v218_v51 = vrot.slane %v217_v49, 1  ;;  %v222_v52 = vld [vmem:[#allocation0 + $0x47] ss:$-1 sm:$0xff] }
  0x16   :  { %199 = vst.msk [vmem:[#allocation1 + $0x10] sm:$0xff] %vm170_vm0, %v195_v46  ;;  %v223_v54 = vrot.slane %v222_v52, 1  ;;  %v235_v56 = vld [vmem:[#allocation0 + $0x3f] ss:$-1 sm:$0xff]  ;;  %v245_v57 = vld [vmem:[#allocation0 + $0x57] ss:$-1 sm:$0xff] }
  0x17   :  { %212 = vst.msk [vmem:[#allocation1 + $0x18] sm:$0xff] %vm170_vm0, %v208_v50  ;;  %219 = vst [vmem:[#allocation1 + $0x20] sm:$0xff] %v218_v51  ;;  %v236_v58 = vrot.slane %v235_v56, 1  ;;  %v246_v59 = vrot.slane %v245_v57, 1  ;;  %v250_v60 = vld [vmem:[#allocation0 + $0x5f] ss:$-1 sm:$0xff] }
  0x18   :  { %v258_v61 = vld [vmem:[#allocation0 + $0x4f] ss:$-1 sm:$0xff]  ;;  %227 = vst.msk [vmem:[#allocation1 + $0x20] sm:$0xff] %vm170_vm0, %v223_v54  ;;  %232 = vst [vmem:[#allocation1 + $0x28] sm:$0xff] %v231_v55  ;;  %v251_v62 = vrot.slane %v250_v60, 1 }
  0x19   :  { %v259_v63 = vrot.slane %v258_v61, 1  ;;  %v263_v0 = vld [vmem:[#allocation0 + $0x57] ss:$-1 sm:$0xff]  ;;  %v273_v1 = vld [vmem:[#allocation0 + $0x6f] ss:$-1 sm:$0xff]  ;;  %240 = vst.msk [vmem:[#allocation1 + $0x28] sm:$0xff] %vm170_vm0, %v236_v58 }
  0x1a   :  { %247 = vst [vmem:[#allocation1 + $0x30] sm:$0xff] %v246_v59  ;;  %v264_v2 = vrot.slane %v263_v0, 1  ;;  %v274_v3 = vrot.slane %v273_v1, 1  ;;  %v278_v4 = vld [vmem:[#allocation0 + $0x77] ss:$-1 sm:$0xff] }
  0x1b   :  { %v286_v5 = vld [vmem:[#allocation0 + $0x67] ss:$-1 sm:$0xff]  ;;  %255 = vst.msk [vmem:[#allocation1 + $0x30] sm:$0xff] %vm170_vm0, %v251_v62  ;;  %260 = vst [vmem:[#allocation1 + $0x38] sm:$0xff] %v259_v63  ;;  %v279_v6 = vrot.slane %v278_v4, 1 }
  0x1c   :  { %v287_v7 = vrot.slane %v286_v5, 1  ;;  %v291_v8 = vld [vmem:[#allocation0 + $0x6f] ss:$-1 sm:$0xff]  ;;  %v301_v9 = vld [vmem:[#allocation0 + $0x87] ss:$-1 sm:$0xff]  ;;  %268 = vst.msk [vmem:[#allocation1 + $0x38] sm:$0xff] %vm170_vm0, %v264_v2 }
  0x1d   :  { %275 = vst [vmem:[#allocation1 + $0x40] sm:$0xff] %v274_v3  ;;  %v292_v10 = vrot.slane %v291_v8, 1  ;;  %v302_v11 = vrot.slane %v301_v9, 1  ;;  %v306_v12 = vld [vmem:[#allocation0 + $0x8f] ss:$-1 sm:$0xff] }
  0x1e   :  { %v314_v13 = vld [vmem:[#allocation0 + $0x7f] ss:$-1 sm:$0xff]  ;;  %283 = vst.msk [vmem:[#allocation1 + $0x40] sm:$0xff] %vm170_vm0, %v279_v6  ;;  %288 = vst [vmem:[#allocation1 + $0x48] sm:$0xff] %v287_v7  ;;  %v307_v14 = vrot.slane %v306_v12, 1 }
  0x1f   :  { %v315_v15 = vrot.slane %v314_v13, 1  ;;  %v319_v16 = vld [vmem:[#allocation0 + $0x87] ss:$-1 sm:$0xff]  ;;  %v329_v17 = vld [vmem:[#allocation0 + $0x9f] ss:$-1 sm:$0xff]  ;;  %296 = vst.msk [vmem:[#allocation1 + $0x48] sm:$0xff] %vm170_vm0, %v292_v10 }
  0x20   :  { %303 = vst [vmem:[#allocation1 + $0x50] sm:$0xff] %v302_v11  ;;  %v320_v18 = vrot.slane %v319_v16, 1  ;;  %v330_v19 = vrot.slane %v329_v17, 1  ;;  %v334_v20 = vld [vmem:[#allocation0 + $0xa7] ss:$-1 sm:$0xff] }
  0x21   :  { %v342_v21 = vld [vmem:[#allocation0 + $0x97] ss:$-1 sm:$0xff]  ;;  %311 = vst.msk [vmem:[#allocation1 + $0x50] sm:$0xff] %vm170_vm0, %v307_v14  ;;  %316 = vst [vmem:[#allocation1 + $0x58] sm:$0xff] %v315_v15  ;;  %v335_v22 = vrot.slane %v334_v20, 1 }
  0x22   :  { %v343_v23 = vrot.slane %v342_v21, 1  ;;  %v347_v24 = vld [vmem:[#allocation0 + $0x9f] ss:$-1 sm:$0xff]  ;;  %v357_v26 = vld [vmem:[#allocation0 + $0xb7] ss:$-1 sm:$0xff]  ;;  %324 = vst.msk [vmem:[#allocation1 + $0x58] sm:$0xff] %vm170_vm0, %v320_v18 }
  0x23   :  { %331 = vst [vmem:[#allocation1 + $0x60] sm:$0xff] %v330_v19  ;;  %v348_v27 = vrot.slane %v347_v24, 1  ;;  %v358_v28 = vrot.slane %v357_v26, 1  ;;  %v362_v29 = vld [vmem:[#allocation0 + $0xbf] ss:$-1 sm:$0xff] }
  0x24   :  { %v370_v30 = vld [vmem:[#allocation0 + $0xaf] ss:$-1 sm:$0xff]  ;;  %339 = vst.msk [vmem:[#allocation1 + $0x60] sm:$0xff] %vm170_vm0, %v335_v22  ;;  %344 = vst [vmem:[#allocation1 + $0x68] sm:$0xff] %v343_v23  ;;  %v363_v31 = vrot.slane %v362_v29, 1 }
  0x25   :  { %v371_v32 = vrot.slane %v370_v30, 1  ;;  %v375_v33 = vld [vmem:[#allocation0 + $0xb7] ss:$-1 sm:$0xff]  ;;  %v385_v34 = vld [vmem:[#allocation0 + $0xcf] ss:$-1 sm:$0xff]  ;;  %352 = vst.msk [vmem:[#allocation1 + $0x68] sm:$0xff] %vm170_vm0, %v348_v27 }
  0x26   :  { %359 = vst [vmem:[#allocation1 + $0x70] sm:$0xff] %v358_v28  ;;  %v376_v35 = vrot.slane %v375_v33, 1  ;;  %v386_v36 = vrot.slane %v385_v34, 1  ;;  %v390_v37 = vld [vmem:[#allocation0 + $0xd7] ss:$-1 sm:$0xff]  ;;  %v710_v25 = vld [vmem:[#allocation1 + $0x40] sm:$0xff] }
  0x27   :  { %v398_v38 = vld [vmem:[#allocation0 + $0xc7] ss:$-1 sm:$0xff]  ;;  %367 = vst.msk [vmem:[#allocation1 + $0x70] sm:$0xff] %vm170_vm0, %v363_v31  ;;  %372 = vst [vmem:[#allocation1 + $0x78] sm:$0xff] %v371_v32  ;;  %v391_v39 = vrot.slane %v390_v37, 1 }
  0x28   :  { %v399_v40 = vrot.slane %v398_v38, 1  ;;  %v403_v41 = vld [vmem:[#allocation0 + $0xcf] ss:$-1 sm:$0xff]  ;;  %v413_v42 = vld [vmem:[#allocation0 + $0xe7] ss:$-1 sm:$0xff]  ;;  %380 = vst.msk [vmem:[#allocation1 + $0x78] sm:$0xff] %vm170_vm0, %v376_v35 }
  0x29   :  { %387 = vst [vmem:[#allocation1 + $0x80] sm:$0xff] %v386_v36  ;;  %v404_v43 = vrot.slane %v403_v41, 1  ;;  %v414_v44 = vrot.slane %v413_v42, 1  ;;  %v418_v45 = vld [vmem:[#allocation0 + $0xef] ss:$-1 sm:$0xff]  ;;  %v694_v35 = vld [vmem:[#allocation1] sm:$0xff] }
  0x2a   :  { %v426_v46 = vld [vmem:[#allocation0 + $0xdf] ss:$-1 sm:$0xff]  ;;  %395 = vst.msk [vmem:[#allocation1 + $0x80] sm:$0xff] %vm170_vm0, %v391_v39  ;;  %400 = vst [vmem:[#allocation1 + $0x88] sm:$0xff] %v399_v40  ;;  %v419_v47 = vrot.slane %v418_v45, 1  ;;  %v696_v36 = vld [vmem:[#allocation1 + $0x8] sm:$0xff] }
  0x2b   :  { %v427_v48 = vrot.slane %v426_v46, 1  ;;  %v431_v49 = vld [vmem:[#allocation0 + $0xe7] ss:$-1 sm:$0xff]  ;;  %v441_v50 = vld [vmem:[#allocation0 + $0xff] ss:$-1 sm:$0xff]  ;;  %408 = vst.msk [vmem:[#allocation1 + $0x88] sm:$0xff] %vm170_vm0, %v404_v43  ;;  %695 = vst [vmem:[%s1162_s1] sm:$0xff] %v694_v35 }
  0x2c   :  { %415 = vst [vmem:[#allocation1 + $0x90] sm:$0xff] %v414_v44  ;;  %v432_v51 = vrot.slane %v431_v49, 1  ;;  %v442_v52 = vrot.slane %v441_v50, 1  ;;  %v446_v53 = vld [vmem:[#allocation0 + $0x107] ss:$-1 sm:$0xff]  ;;  %697 = vst [vmem:[%s1162_s1 + $0x8] sm:$0xff] %v696_v36 }
  0x2d   :  { %v454_v54 = vld [vmem:[#allocation0 + $0xf7] ss:$-1 sm:$0xff]  ;;  %423 = vst.msk [vmem:[#allocation1 + $0x90] sm:$0xff] %vm170_vm0, %v419_v47  ;;  %428 = vst [vmem:[#allocation1 + $0x98] sm:$0xff] %v427_v48  ;;  %v447_v55 = vrot.slane %v446_v53, 1  ;;  %v700_v39 = vld [vmem:[#allocation1 + $0x18] sm:$0xff] }
  0x2e   :  { %v455_v56 = vrot.slane %v454_v54, 1  ;;  %v459_v57 = vld [vmem:[#allocation0 + $0xff] ss:$-1 sm:$0xff]  ;;  %v469_v58 = vld [vmem:[#allocation0 + $0x117] ss:$-1 sm:$0xff]  ;;  %436 = vst.msk [vmem:[#allocation1 + $0x98] sm:$0xff] %vm170_vm0, %v432_v51 }
  0x2f   :  { %443 = vst [vmem:[#allocation1 + $0xa0] sm:$0xff] %v442_v52  ;;  %v460_v59 = vrot.slane %v459_v57, 1  ;;  %v470_v60 = vrot.slane %v469_v58, 1  ;;  %v474_v61 = vld [vmem:[#allocation0 + $0x11f] ss:$-1 sm:$0xff]  ;;  %v698_v38 = vld [vmem:[#allocation1 + $0x10] sm:$0xff] }
  0x30   :  { %v482_v62 = vld [vmem:[#allocation0 + $0x10f] ss:$-1 sm:$0xff]  ;;  %451 = vst.msk [vmem:[#allocation1 + $0xa0] sm:$0xff] %vm170_vm0, %v447_v55  ;;  %456 = vst [vmem:[#allocation1 + $0xa8] sm:$0xff] %v455_v56  ;;  %v475_v63 = vrot.slane %v474_v61, 1  ;;  %v702_v40 = vld [vmem:[#allocation1 + $0x20] sm:$0xff] }
  0x31   :  { %v483_v0 = vrot.slane %v482_v62, 1  ;;  %v487_v1 = vld [vmem:[#allocation0 + $0x117] ss:$-1 sm:$0xff]  ;;  %v497_v2 = vld [vmem:[#allocation0 + $0x12f] ss:$-1 sm:$0xff]  ;;  %464 = vst.msk [vmem:[#allocation1 + $0xa8] sm:$0xff] %vm170_vm0, %v460_v59 }
  0x32   :  { %471 = vst [vmem:[#allocation1 + $0xb0] sm:$0xff] %v470_v60  ;;  %v488_v3 = vrot.slane %v487_v1, 1  ;;  %v498_v4 = vrot.slane %v497_v2, 1  ;;  %v502_v5 = vld [vmem:[#allocation0 + $0x137] ss:$-1 sm:$0xff]  ;;  %699 = vst [vmem:[%s1162_s1 + $0x10] sm:$0xff] %v698_v38 }
  0x33   :  { %v510_v6 = vld [vmem:[#allocation0 + $0x127] ss:$-1 sm:$0xff]  ;;  %479 = vst.msk [vmem:[#allocation1 + $0xb0] sm:$0xff] %vm170_vm0, %v475_v63  ;;  %484 = vst [vmem:[#allocation1 + $0xb8] sm:$0xff] %v483_v0  ;;  %v503_v7 = vrot.slane %v502_v5, 1  ;;  %v704_v41 = vld [vmem:[#allocation1 + $0x28] sm:$0xff] }
  0x34   :  { %v511_v8 = vrot.slane %v510_v6, 1  ;;  %v515_v9 = vld [vmem:[#allocation0 + $0x12f] ss:$-1 sm:$0xff]  ;;  %v525_v10 = vld [vmem:[#allocation0 + $0x147] ss:$-1 sm:$0xff]  ;;  %492 = vst.msk [vmem:[#allocation1 + $0xb8] sm:$0xff] %vm170_vm0, %v488_v3 }
  0x35   :  { %499 = vst [vmem:[#allocation1 + $0xc0] sm:$0xff] %v498_v4  ;;  %v516_v11 = vrot.slane %v515_v9, 1  ;;  %v526_v12 = vrot.slane %v525_v10, 1  ;;  %v530_v13 = vld [vmem:[#allocation0 + $0x14f] ss:$-1 sm:$0xff]  ;;  %701 = vst [vmem:[%s1162_s1 + $0x18] sm:$0xff] %v700_v39 }
  0x36   :  { %v538_v14 = vld [vmem:[#allocation0 + $0x13f] ss:$-1 sm:$0xff]  ;;  %507 = vst.msk [vmem:[#allocation1 + $0xc0] sm:$0xff] %vm170_vm0, %v503_v7  ;;  %512 = vst [vmem:[#allocation1 + $0xc8] sm:$0xff] %v511_v8  ;;  %v531_v15 = vrot.slane %v530_v13, 1  ;;  %v706_v42 = vld [vmem:[#allocation1 + $0x30] sm:$0xff] }
  0x37   :  { %v539_v16 = vrot.slane %v538_v14, 1  ;;  %v543_v17 = vld [vmem:[#allocation0 + $0x147] ss:$-1 sm:$0xff]  ;;  %v553_v18 = vld [vmem:[#allocation0 + $0x15f] ss:$-1 sm:$0xff]  ;;  %520 = vst.msk [vmem:[#allocation1 + $0xc8] sm:$0xff] %vm170_vm0, %v516_v11 }
  0x38   :  { %527 = vst [vmem:[#allocation1 + $0xd0] sm:$0xff] %v526_v12  ;;  %v544_v19 = vrot.slane %v543_v17, 1  ;;  %v554_v20 = vrot.slane %v553_v18, 1  ;;  %v558_v21 = vld [vmem:[#allocation0 + $0x167] ss:$-1 sm:$0xff]  ;;  %703 = vst [vmem:[%s1162_s1 + $0x20] sm:$0xff] %v702_v40 }
  0x39   :  { %v566_v22 = vld [vmem:[#allocation0 + $0x157] ss:$-1 sm:$0xff]  ;;  %535 = vst.msk [vmem:[#allocation1 + $0xd0] sm:$0xff] %vm170_vm0, %v531_v15  ;;  %540 = vst [vmem:[#allocation1 + $0xd8] sm:$0xff] %v539_v16  ;;  %v559_v23 = vrot.slane %v558_v21, 1  ;;  %v708_v43 = vld [vmem:[#allocation1 + $0x38] sm:$0xff] }
  0x3a   :  { %v567_v24 = vrot.slane %v566_v22, 1  ;;  %v571_v26 = vld [vmem:[#allocation0 + $0x15f] ss:$-1 sm:$0xff]  ;;  %v581_v27 = vld [vmem:[#allocation0 + $0x177] ss:$-1 sm:$0xff]  ;;  %548 = vst.msk [vmem:[#allocation1 + $0xd8] sm:$0xff] %vm170_vm0, %v544_v19 }
  0x3b   :  { %555 = vst [vmem:[#allocation1 + $0xe0] sm:$0xff] %v554_v20  ;;  %v572_v28 = vrot.slane %v571_v26, 1  ;;  %v582_v29 = vrot.slane %v581_v27, 1  ;;  %v586_v30 = vld [vmem:[#allocation0 + $0x17f] ss:$-1 sm:$0xff]  ;;  %705 = vst [vmem:[%s1162_s1 + $0x28] sm:$0xff] %v704_v41 }
  0x3c   :  { %v594_v31 = vld [vmem:[#allocation0 + $0x16f] ss:$-1 sm:$0xff]  ;;  %563 = vst.msk [vmem:[#allocation1 + $0xe0] sm:$0xff] %vm170_vm0, %v559_v23  ;;  %568 = vst [vmem:[#allocation1 + $0xe8] sm:$0xff] %v567_v24  ;;  %v587_v32 = vrot.slane %v586_v30, 1  ;;  %v714_v45 = vld [vmem:[#allocation1 + $0x50] sm:$0xff] }
  0x3d   :  { %v595_v33 = vrot.slane %v594_v31, 1  ;;  %v599_v34 = vld [vmem:[#allocation0 + $0x177] ss:$-1 sm:$0xff]  ;;  %576 = vst.msk [vmem:[#allocation1 + $0xe8] sm:$0xff] %vm170_vm0, %v572_v28  ;;  %583 = vst [vmem:[#allocation1 + $0xf0] sm:$0xff] %v582_v29  ;;  %v712_v44 = vld [vmem:[#allocation1 + $0x48] sm:$0xff] }
  0x3e   :  { %v600_v37 = vrot.slane %v599_v34, 1  ;;  %591 = vst.msk [vmem:[#allocation1 + $0xf0] sm:$0xff] %vm170_vm0, %v587_v32  ;;  %707 = vst [vmem:[%s1162_s1 + $0x30] sm:$0xff] %v706_v42  ;;  %v716_v46 = vld [vmem:[#allocation1 + $0x58] sm:$0xff]  ;;  %v718_v47 = vld [vmem:[#allocation1 + $0x60] sm:$0xff] }
  0x3f   :  { %596 = vst [vmem:[#allocation1 + $0xf8] sm:$0xff] %v595_v33  ;;  %709 = vst [vmem:[%s1162_s1 + $0x38] sm:$0xff] %v708_v43  ;;  %v720_v48 = vld [vmem:[#allocation1 + $0x68] sm:$0xff]  ;;  %v722_v49 = vld [vmem:[#allocation1 + $0x70] sm:$0xff] }
  0x40   :  { %604 = vst.msk [vmem:[#allocation1 + $0xf8] sm:$0xff] %vm170_vm0, %v600_v37  ;;  %711 = vst [vmem:[%s1162_s1 + $0x40] sm:$0xff] %v710_v25  ;;  %v724_v50 = vld [vmem:[#allocation1 + $0x78] sm:$0xff]  ;;  %v726_v51 = vld [vmem:[#allocation1 + $0x80] sm:$0xff] }
  0x41   :  { %713 = vst [vmem:[%s1162_s1 + $0x48] sm:$0xff] %v712_v44  ;;  %715 = vst [vmem:[%s1162_s1 + $0x50] sm:$0xff] %v714_v45  ;;  %v728_v52 = vld [vmem:[#allocation1 + $0x88] sm:$0xff]  ;;  %v730_v53 = vld [vmem:[#allocation1 + $0x90] sm:$0xff] }
  0x42   :  { %717 = vst [vmem:[%s1162_s1 + $0x58] sm:$0xff] %v716_v46  ;;  %719 = vst [vmem:[%s1162_s1 + $0x60] sm:$0xff] %v718_v47  ;;  %v732_v54 = vld [vmem:[#allocation1 + $0x98] sm:$0xff]  ;;  %v734_v55 = vld [vmem:[#allocation1 + $0xa0] sm:$0xff] }
  0x43   :  { %721 = vst [vmem:[%s1162_s1 + $0x68] sm:$0xff] %v720_v48  ;;  %723 = vst [vmem:[%s1162_s1 + $0x70] sm:$0xff] %v722_v49  ;;  %v736_v56 = vld [vmem:[#allocation1 + $0xa8] sm:$0xff]  ;;  %v738_v57 = vld [vmem:[#allocation1 + $0xb0] sm:$0xff] }
  0x44   :  { %725 = vst [vmem:[%s1162_s1 + $0x78] sm:$0xff] %v724_v50  ;;  %727 = vst [vmem:[%s1162_s1 + $0x80] sm:$0xff] %v726_v51  ;;  %v740_v58 = vld [vmem:[#allocation1 + $0xb8] sm:$0xff]  ;;  %v742_v59 = vld [vmem:[#allocation1 + $0xc0] sm:$0xff] }
  0x45   :  { %729 = vst [vmem:[%s1162_s1 + $0x88] sm:$0xff] %v728_v52  ;;  %731 = vst [vmem:[%s1162_s1 + $0x90] sm:$0xff] %v730_v53  ;;  %v744_v60 = vld [vmem:[#allocation1 + $0xc8] sm:$0xff]  ;;  %v746_v61 = vld [vmem:[#allocation1 + $0xd0] sm:$0xff] }
  0x46   :  { %733 = vst [vmem:[%s1162_s1 + $0x98] sm:$0xff] %v732_v54  ;;  %735 = vst [vmem:[%s1162_s1 + $0xa0] sm:$0xff] %v734_v55  ;;  %v748_v62 = vld [vmem:[#allocation1 + $0xd8] sm:$0xff]  ;;  %v750_v63 = vld [vmem:[#allocation1 + $0xe0] sm:$0xff] }
  0x47   :  { %737 = vst [vmem:[%s1162_s1 + $0xa8] sm:$0xff] %v736_v56  ;;  %739 = vst [vmem:[%s1162_s1 + $0xb0] sm:$0xff] %v738_v57  ;;  %v752_v0 = vld [vmem:[#allocation1 + $0xe8] sm:$0xff]  ;;  %v754_v1 = vld [vmem:[#allocation1 + $0xf0] sm:$0xff] }
  0x48   :  { %741 = vst [vmem:[%s1162_s1 + $0xb8] sm:$0xff] %v740_v58  ;;  %743 = vst [vmem:[%s1162_s1 + $0xc0] sm:$0xff] %v742_v59  ;;  %v756_v2 = vld [vmem:[#allocation1 + $0xf8] sm:$0xff] }
  0x49   :  { %745 = vst [vmem:[%s1162_s1 + $0xc8] sm:$0xff] %v744_v60  ;;  %747 = vst [vmem:[%s1162_s1 + $0xd0] sm:$0xff] %v746_v61 }
  0x4a   :  { %749 = vst [vmem:[%s1162_s1 + $0xd8] sm:$0xff] %v748_v62  ;;  %751 = vst [vmem:[%s1162_s1 + $0xe0] sm:$0xff] %v750_v63 }
  0x4b   :  { %753 = vst [vmem:[%s1162_s1 + $0xe8] sm:$0xff] %v752_v0  ;;  %755 = vst [vmem:[%s1162_s1 + $0xf0] sm:$0xff] %v754_v1 }
  0x4c   :  { %757 = vst [vmem:[%s1162_s1 + $0xf8] sm:$0xff] %v756_v2 }

// kernel: tile.6
= control target key start
LH: loop header
LB: loop body
LE: loop exit
PB: predicated region body
PF: predicated region fallthrough
CT: control target
= control target key end

     0   :  { %s40_s0 = inlined_call_operand.vmem [shape: f32[8], index: 0, kind: input, shape index: {}]   ;;  %s41_s1 = inlined_call_operand.vmem [shape: f32[32,8], index: 1, kind: output, shape index: {}]  }
   0x1   :  { %v4_v0 = vld [vmem:[%s40_s0] ss:$0 sm:$0xff] }
   0x2   :  { %5 = vst [vmem:[%s41_s1] sm:$0xff] %v4_v0  ;;  %12 = vst [vmem:[%s41_s1 + $0x8] sm:$0xff] %v4_v0 }
   0x3   :  { %13 = vst [vmem:[%s41_s1 + $0x10] sm:$0xff] %v4_v0  ;;  %14 = vst [vmem:[%s41_s1 + $0x18] sm:$0xff] %v4_v0 }

// kernel: tile.7
= control target key start
LH: loop header
LB: loop body
LE: loop exit
PB: predicated region body
PF: predicated region fallthrough
CT: control target
= control target key end

     0   :  { %s7_s6 = smov 3  ;;  %s21_s9 = smov 3  ;;  %vm4_vm0 = vcmask 64512   ;;  %vm11_vm1 = vcmask 1048512   ;;  %vm18_vm2 = vcmask 982912   ;;  %vm25_vm3 = vcmask 917312   ;;  %s232_s0 = inlined_call_operand.vmem [shape: f32[32,8], index: 0, kind: input, shape index: {}]   ;;  %s233_s1 = inlined_call_operand.vmem [shape: f32[1,256], index: 1, kind: output, shape index: {}]  }
   0x1   :  { %v122_v0 = vld [vmem:[%s232_s0 + $0xf] ss:$16 sm:%s7_s6]   ;;  %s153_s10 = smov 120   ;;  %v124_v1 = vld [vmem:[%s232_s0 + $0xd] ss:$16 sm:%s21_s9]   ;;  %s14_s13 = smov 3 }
   0x2   :  { %9 = vrot.lane.b32.xlu0 %v122_v0, %s153_s10  ;;  %s154_s14 = smov 104   ;;  %v123_v2 = vld [vmem:[%s232_s0 + $0xe] ss:$16 sm:%s14_s13]   ;;  %s28_s17 = smov 3  ;;  %vm32_vm4 = vcmask 851712   ;;  %vm39_vm5 = vcmask 786112  }
   0x3   :  { %23 = vrot.lane.b32.xlu1 %v124_v1, %s154_s14  ;;  %v125_v3 = vld [vmem:[%s232_s0 + $0xc] ss:$16 sm:%s28_s17]   ;;  %s35_s20 = smov 3  ;;  %s42_s21 = smov 3  ;;  %vm46_vm6 = vcmask 720512   ;;  %vm53_vm7 = vcmask 654912  }
   0x4   :  { %s155_s22 = smov 112   ;;  %s156_s23 = smov 96   ;;  %v126_v4 = vld [vmem:[%s232_s0 + $0xb] ss:$16 sm:%s35_s20]   ;;  %v127_v5 = vld [vmem:[%s232_s0 + $0xa] ss:$16 sm:%s42_s21]  }
   0x5   :  { %s49_s28 = smov 3  ;;  %s56_s29 = smov 3  ;;  %vm60_vm8 = vcmask 589312   ;;  %vm67_vm9 = vcmask 523712   ;;  %vm74_vm10 = vcmask 458112   ;;  %vm81_vm11 = vcmask 392512  }
   0x6   :  { %16 = vrot.lane.b32.xlu0 %v123_v2, %s155_s22  ;;  %s157_s30 = smov 88   ;;  %s158_s2 = smov 80   ;;  %v128_v6 = vld [vmem:[%s232_s0 + $0x9] ss:$16 sm:%s49_s28]   ;;  %vm88_vm12 = vcmask 326912   ;;  %vm95_vm13 = vcmask 261312  }
   0x7   :  { %30 = vrot.lane.b32.xlu1 %v125_v3, %s156_s23  ;;  %v129_v7 = vld [vmem:[%s232_s0 + $0x8] ss:$16 sm:%s56_s29]   ;;  %s63_s7 = smov 3  ;;  %s70_s8 = smov 3  ;;  %vm102_vm14 = vcmask 195712   ;;  %vm109_vm15 = vcmask 130112  }
   0x8   :  { %s159_s9 = smov 72   ;;  %s160_s10 = smov 64   ;;  %v130_v8 = vld [vmem:[%s232_s0 + $0x7] ss:$16 sm:%s63_s7]   ;;  %v131_v9 = vld [vmem:[%s232_s0 + $0x6] ss:$16 sm:%s70_s8]  }
   0x9   :  { %s2_s13 = smov 3  ;;  %s77_s16 = smov 3 }
   0xa   :  { %37 = vrot.lane.b32.xlu0 %v126_v4, %s157_s30  ;;  %v3_v10 = vld [vmem:[%s232_s0] ss:$16 sm:%s2_s13]   ;;  %s84_s19 = smov 3  ;;  %s161_s20 = smov 56  }
   0xb   :  { %44 = vrot.lane.b32.xlu1 %v127_v5, %s158_s2  ;;  %5 = vst.msk [vmem:[#allocation0] ss:$8 sm:$0x3] %vm4_vm0, %v3_v10   ;;  %s162_s21 = smov 48   ;;  %v132_v11 = vld [vmem:[%s232_s0 + $0x5] ss:$16 sm:%s77_s16]  }
   0xc   :  { %v133_v12 = vld [vmem:[%s232_s0 + $0x4] ss:$16 sm:%s84_s19]   ;;  %s91_s26 = smov 3  ;;  %s98_s27 = smov 3 }
   0xd   :  { %s163_s28 = smov 40   ;;  %s164_s29 = smov 32   ;;  %v134_v13 = vld [vmem:[%s232_s0 + $0x3] ss:$16 sm:%s91_s26]   ;;  %v135_v14 = vld [vmem:[%s232_s0 + $0x2] ss:$16 sm:%s98_s27]  }
   0xe   :  { %51 = vrot.lane.b32.xlu0 %v128_v6, %s159_s9  ;;  %s105_s5 = smov 3  ;;  %s165_s6 = smov 24  }
   0xf   :  { %58 = vrot.lane.b32.xlu1 %v129_v7, %s160_s10  ;;  %s166_s7 = smov 16   ;;  %v136_v15 = vld [vmem:[%s232_s0 + $0x1] ss:$16 sm:%s105_s5]   ;;  %s167_s0 = smov 8  }
  0x12   :  { %65 = vrot.lane.b32.xlu0 %v130_v8, %s161_s20 }
  0x13   :  { %72 = vrot.lane.b32.xlu1 %v131_v9, %s162_s21 }
  0x16   :  { %79 = vrot.lane.b32.xlu0 %v132_v11, %s163_s28 }
  0x17   :  { %86 = vrot.lane.b32.xlu1 %v133_v12, %s164_s29 }
  0x1a   :  { %93 = vrot.lane.b32.xlu0 %v134_v13, %s165_s6 }
  0x1b   :  { %100 = vrot.lane.b32.xlu1 %v135_v14, %s166_s7 }
  0x1e   :  { %107 = vrot.lane.b32.xlu0 %v136_v15, %s167_s0 }
  0x74   :  { %v10_v16 = vpop.permute.xlu0 %9  }
  0x75   :  { %12 = vst.msk [vmem:[#allocation0] ss:$8 sm:$0x3] %vm11_vm1, %v10_v16   ;;  %v24_v17 = vpop.permute.xlu1 %23  }
  0x78   :  { %v17_v18 = vpop.permute.xlu0 %16  }
  0x79   :  { %19 = vst.msk [vmem:[#allocation0] ss:$8 sm:$0x3] %vm18_vm2, %v17_v18   ;;  %v31_v19 = vpop.permute.xlu1 %30  }
  0x7a   :  { %26 = vst.msk [vmem:[#allocation0] ss:$8 sm:$0x3] %vm25_vm3, %v24_v17  }
  0x7b   :  { %33 = vst.msk [vmem:[#allocation0] ss:$8 sm:$0x3] %vm32_vm4, %v31_v19  }
  0x7c   :  { %v38_v20 = vpop.permute.xlu0 %37  }
  0x7d   :  { %40 = vst.msk [vmem:[#allocation0] ss:$8 sm:$0x3] %vm39_vm5, %v38_v20   ;;  %v45_v21 = vpop.permute.xlu1 %44  }
  0x7e   :  { %47 = vst.msk [vmem:[#allocation0] ss:$8 sm:$0x3] %vm46_vm6, %v45_v21  }
  0x80   :  { %v52_v22 = vpop.permute.xlu0 %51  }
  0x81   :  { %54 = vst.msk [vmem:[#allocation0] ss:$8 sm:$0x3] %vm53_vm7, %v52_v22   ;;  %v59_v23 = vpop.permute.xlu1 %58  }
  0x82   :  { %61 = vst.msk [vmem:[#allocation0] ss:$8 sm:$0x3] %vm60_vm8, %v59_v23  }
  0x84   :  { %v66_v24 = vpop.permute.xlu0 %65  }
  0x85   :  { %68 = vst.msk [vmem:[#allocation0] ss:$8 sm:$0x3] %vm67_vm9, %v66_v24   ;;  %v73_v25 = vpop.permute.xlu1 %72  }
  0x86   :  { %75 = vst.msk [vmem:[#allocation0] ss:$8 sm:$0x3] %vm74_vm10, %v73_v25  }
  0x88   :  { %v80_v26 = vpop.permute.xlu0 %79  }
  0x89   :  { %82 = vst.msk [vmem:[#allocation0] ss:$8 sm:$0x3] %vm81_vm11, %v80_v26   ;;  %v87_v27 = vpop.permute.xlu1 %86  }
  0x8a   :  { %89 = vst.msk [vmem:[#allocation0] ss:$8 sm:$0x3] %vm88_vm12, %v87_v27  }
  0x8c   :  { %v94_v28 = vpop.permute.xlu0 %93  }
  0x8d   :  { %96 = vst.msk [vmem:[#allocation0] ss:$8 sm:$0x3] %vm95_vm13, %v94_v28   ;;  %v101_v29 = vpop.permute.xlu1 %100  }
  0x8e   :  { %103 = vst.msk [vmem:[#allocation0] ss:$8 sm:$0x3] %vm102_vm14, %v101_v29  }
  0x90   :  { %v108_v30 = vpop.permute.xlu0 %107  }
  0x91   :  { %110 = vst.msk [vmem:[#allocation0] ss:$8 sm:$0x3] %vm109_vm15, %v108_v30  }
  0x98   :  { %v114_v31 = vld [vmem:[#allocation0] sm:$0x1]  ;;  %v118_v32 = vld [vmem:[#allocation0 + $0x8] sm:$0x1] }
  0x99   :  { %116 = vst [vmem:[%s233_s1] sm:$0x1] %v114_v31  ;;  %137 = vst [vmem:[%s233_s1 + $0x1] sm:$0x1] %v118_v32 }

// kernel: _lambda_.1
= control target key start
LH: loop header
LB: loop body
LE: loop exit
PB: predicated region body
PF: predicated region fallthrough
CT: control target
= control target key end

     0   :  { %v569_v3 = vmov 0.0   ;;  %vm40_vm0 = vcmask 523264   ;;  %vm162_vm1 = vcmask 261120   ;;  %v152_v49 = vlaneseq  ;;  %s924_s3 = inlined_call_operand.vmem [shape: f32[64,256], index: 3, kind: input, shape index: {}]   ;;  %s925_s0 = inlined_call_operand.vmem [shape: f32[32,64], index: 0, kind: input, shape index: {}]   ;;  %s926_s2 = inlined_call_operand.vmem [shape: f32[64,32], index: 2, kind: input, shape index: {}]   ;;  %s927_s4 = inlined_call_operand.vmem [shape: f32[1,256], index: 4, kind: input, shape index: {}]   ;;  %s928_s1 = inlined_call_operand.vmem [shape: f32[64,256], index: 1, kind: input, shape index: {}]   ;;  %s929_s5 = inlined_call_operand.vmem [shape: f32[64,256], index: 5, kind: output, shape index: {}]  }
   0x1   :  { %v25_v0 = vld [vmem:[%s924_s3 + $0x8] sm:$0xff]  ;;  %v27_v1 = vld [vmem:[%s924_s3 + $0x18] sm:$0xff]  ;;  %v24_v2 = vld [vmem:[%s924_s3] sm:$0xff]  ;;  %117 = vmatprep.mubr.f32.mxu0 %v569_v3  ;;  %257 = vmatprep.mubr.f32.mxu1 %v569_v3 }
   0x2   :  { %v508_v4 = vpack.c.bf16 %v27_v1, %v25_v0  ;;  %v26_v5 = vld [vmem:[%s924_s3 + $0x10] sm:$0xff]  ;;  %v29_v6 = vld [vmem:[%s924_s3 + $0x28] sm:$0xff]  ;;  %v31_v7 = vld [vmem:[%s924_s3 + $0x38] sm:$0xff]  ;;  %v153_v50 = vshrl.u32 %v152_v49, 7 }
   0x3   :  { %v510_v8 = vpack.c.bf16 %v26_v5, %v24_v2  ;;  %v512_v9 = vpack.c.bf16 %v31_v7, %v29_v6  ;;  %v28_v10 = vld [vmem:[%s924_s3 + $0x20] sm:$0xff]  ;;  %v30_v11 = vld [vmem:[%s924_s3 + $0x30] sm:$0xff]  ;;  %v33_v12 = vld [vmem:[%s924_s3 + $0x48] sm:$0xff] }
   0x4   :  { %509 = vmatprep.subr.bf16.mxu0 %v508_v4  ;;  %v35_v13 = vld [vmem:[%s924_s3 + $0x58] sm:$0xff]  ;;  %v514_v14 = vpack.c.bf16 %v30_v11, %v28_v10  ;;  %v32_v16 = vld [vmem:[%s924_s3 + $0x40] sm:$0xff]  ;;  %v34_v17 = vld [vmem:[%s924_s3 + $0x50] sm:$0xff]  ;;  %v154_v51 = vsub.s32 0, %v153_v50  ;;  %v158_v53 = vsub.s32 1, %v153_v50 }
   0x5   :  { %511 = vmatpush1.bf16.msra.mxu0 %v510_v8  ;;  %v516_v15 = vpack.c.bf16 %v35_v13, %v33_v12  ;;  %v37_v18 = vld [vmem:[%s924_s3 + $0x68] sm:$0xff]  ;;  %v39_v19 = vld [vmem:[%s924_s3 + $0x78] sm:$0xff]  ;;  %v518_v20 = vpack.c.bf16 %v34_v17, %v32_v16  ;;  %v36_v22 = vld [vmem:[%s924_s3 + $0x60] sm:$0xff] }
   0x6   :  { %513 = vmatprep.subr.bf16.mxu0 %v512_v9  ;;  %v520_v21 = vpack.c.bf16 %v39_v19, %v37_v18  ;;  %v38_v23 = vld [vmem:[%s924_s3 + $0x70] sm:$0xff]  ;;  %v20_v25 = vld [vmem:[%s925_s0] sm:$0xff]  ;;  %v21_v26 = vld [vmem:[%s925_s0 + $0x8] sm:$0xff] }
   0x7   :  { %v522_v24 = vpack.c.bf16 %v38_v23, %v36_v22  ;;  %v22_v27 = vld [vmem:[%s925_s0 + $0x10] sm:$0xff]  ;;  %v23_v28 = vld [vmem:[%s925_s0 + $0x18] sm:$0xff]  ;;  %v143_v41 = vld [vmem:[%s926_s2 + $0x8] sm:$0xff] }
   0x8   :  { %v142_v42 = vld [vmem:[%s926_s2] sm:$0xff]  ;;  %v144_v43 = vld [vmem:[%s926_s2 + $0x10] sm:$0xff]  ;;  %v145_v44 = vld [vmem:[%s926_s2 + $0x18] sm:$0xff] }
   0x9   :  { %515 = vmatpush1.bf16.msra.mxu0 %v514_v14  ;;  %v146_v45 = vld [vmem:[%s926_s2 + $0x20] sm:$0xff]  ;;  %v147_v46 = vld [vmem:[%s926_s2 + $0x28] sm:$0xff]  ;;  %v148_v47 = vld [vmem:[%s926_s2 + $0x30] sm:$0xff] }
   0xa   :  { %517 = vmatprep.subr.bf16.mxu0 %v516_v15  ;;  %v149_v48 = vld [vmem:[%s926_s2 + $0x38] sm:$0xff]  ;;  %v150_v52 = vld [vmem:[%s927_s4] sm:$0x3]  ;;  %v302_v57 = vld [vmem:[%s928_s1 + $0x10] sm:$0xff] }
   0xb   :  { %v707_v54 = vrot.slane %v150_v52, %v154_v51  ;;  %v709_v55 = vrot.slane %v150_v52, %v158_v53  ;;  %v300_v59 = vld [vmem:[%s928_s1] sm:$0xff]  ;;  %v303_v62 = vld [vmem:[%s928_s1 + $0x18] sm:$0xff]  ;;  %v301_v1 = vld [vmem:[%s928_s1 + $0x8] sm:$0xff] }
   0xc   :  { %v304_v13 = vld [vmem:[%s928_s1 + $0x20] sm:$0xff]  ;;  %v305_v18 = vld [vmem:[%s928_s1 + $0x28] sm:$0xff] }
   0xd   :  { %519 = vmatpush1.bf16.msra.mxu0 %v518_v20 }
   0xe   :  { %521 = vmatprep.subr.bf16.mxu0 %v520_v21 }
  0x11   :  { %523 = vmatpush1.bf16.msra.mxu0 %v522_v24 }
  0x14   :  { %496 = vmatmul.mubr.msk.f32.vlgmr.msra.gmra.mrb[0].mxu0 %vm40_vm0, %v20_v25 }
  0x15   :  { %123 = vmatprep.mubr.f32.mxu0 %v569_v3 }
  0x18   :  { %497 = vmatmul.mubr.msk.f32.gmra.mrb[2].mxu0 %vm40_vm0, %v21_v26 }
  0x19   :  { %129 = vmatprep.mubr.f32.mxu0 %v569_v3 }
  0x1c   :  { %498 = vmatmul.mubr.msk.f32.gmra.mrb[4].mxu0 %vm40_vm0, %v22_v27 }
  0x1d   :  { %135 = vmatprep.mubr.f32.mxu0 %v569_v3 }
  0x20   :  { %499 = vmatmul.mubr.msk.f32.gmra.mrb[6].mxu0 %vm40_vm0, %v23_v28 }
  0x21   :  { %251 = vmatprep.mubr.f32.mxu0 %v569_v3 }
  0xe7   :  { %v119_v29 = vpop.f32.mrb[0].mxu0 }
  0xe8   :  { %v121_v30 = vpop.f32.mrb[1].mxu0 }
  0xeb   :  { %v125_v31 = vpop.f32.mrb[2].mxu0 }
  0xec   :  { %v526_v32 = vpack.c.bf16 %v125_v31, %v119_v29  ;;  %v127_v33 = vpop.f32.mrb[3].mxu0  ;;  %v306_v31 = vld [vmem:[%s928_s1 + $0x30] sm:$0xff] }
  0xed   :  { %v524_v34 = vpack.c.bf16 %v127_v33, %v121_v30 }
  0xef   :  { %v131_v35 = vpop.f32.mrb[4].mxu0  ;;  %525 = vmatprep.subr.bf16.mxu0 %v524_v34  ;;  %532 = vmatprep.subr.bf16.mxu1 %v524_v34 }
  0xf0   :  { %v133_v36 = vpop.f32.mrb[5].mxu0  ;;  %527 = vmatpush1.bf16.msra.mxu0 %v526_v32  ;;  %534 = vmatpush1.bf16.msra.mxu1 %v526_v32 }
  0xf3   :  { %v137_v37 = vpop.f32.mrb[6].mxu0 }
  0xf4   :  { %v530_v38 = vpack.c.bf16 %v137_v37, %v131_v35  ;;  %v139_v39 = vpop.f32.mrb[7].mxu0 }
  0xf5   :  { %v528_v40 = vpack.c.bf16 %v139_v39, %v133_v36  ;;  %v307_v36 = vld [vmem:[%s928_s1 + $0x38] sm:$0xff] }
  0xf7   :  { %529 = vmatprep.subr.bf16.mxu0 %v528_v40  ;;  %533 = vmatprep.subr.bf16.mxu1 %v528_v40 }
  0xf8   :  { %531 = vmatpush1.bf16.msra.mxu0 %v530_v38  ;;  %535 = vmatpush1.bf16.msra.mxu1 %v530_v38 }
  0xfb   :  { %501 = vmatmul.mubr.msk.f32.vlgmr.msra.gmra.mrb[0].mxu1 %vm162_vm1, %v143_v41  ;;  %500 = vmatmul.mubr.msk.f32.vlgmr.msra.gmra.mrb[8].mxu0 %vm162_vm1, %v142_v42 }
  0xfc   :  { %263 = vmatprep.mubr.f32.mxu1 %v569_v3 }
  0xff   :  { %502 = vmatmul.mubr.msk.f32.gmra.mrb[2].mxu1 %vm162_vm1, %v144_v43 }
 0x100   :  { %269 = vmatprep.mubr.f32.mxu1 %v569_v3 }
 0x103   :  { %503 = vmatmul.mubr.msk.f32.gmra.mrb[4].mxu1 %vm162_vm1, %v145_v44 }
 0x104   :  { %275 = vmatprep.mubr.f32.mxu1 %v569_v3 }
 0x107   :  { %504 = vmatmul.mubr.msk.f32.gmra.mrb[6].mxu1 %vm162_vm1, %v146_v45 }
 0x108   :  { %281 = vmatprep.mubr.f32.mxu1 %v569_v3 }
 0x10b   :  { %505 = vmatmul.mubr.msk.f32.gmra.mrb[8].mxu1 %vm162_vm1, %v147_v46 }
 0x10c   :  { %287 = vmatprep.mubr.f32.mxu1 %v569_v3 }
 0x10f   :  { %506 = vmatmul.mubr.msk.f32.gmra.mrb[10].mxu1 %vm162_vm1, %v148_v47 }
 0x110   :  { %293 = vmatprep.mubr.f32.mxu1 %v569_v3 }
 0x113   :  { %507 = vmatmul.mubr.msk.f32.gmra.mrb[12].mxu1 %vm162_vm1, %v149_v48 }
 0x1ce   :  { %v259_v56 = vpop.f32.mrb[0].mxu1  ;;  %v253_v58 = vpop.f32.mrb[8].mxu0 }
 0x1cf   :  { %v260_v60 = vadd.f32 %v259_v56, %v707_v54  ;;  %v261_v61 = vpop.f32.mrb[1].mxu1  ;;  %v254_v63 = vadd.f32 %v253_v58, %v707_v54  ;;  %v255_v0 = vpop.f32.mrb[9].mxu0 }
 0x1d0   :  { %v262_v2 = vadd.f32 %v261_v61, %v709_v55  ;;  %v256_v3 = vadd.f32 %v255_v0, %v709_v55 }
 0x1d1   :  { %v318_v4 = vadd.f32 %v302_v57, %v260_v60  ;;  %v727_v5 = vadd.f32 %v300_v59, %v254_v63  ;;  %v308_v57 = vld [vmem:[%s928_s1 + $0x40] sm:$0xff] }
 0x1d2   :  { %v729_v6 = vadd.f32 %v303_v62, %v262_v2  ;;  %v731_v7 = vadd.f32 %v301_v1, %v256_v3  ;;  %v265_v8 = vpop.f32.mrb[2].mxu1  ;;  %v309_v62 = vld [vmem:[%s928_s1 + $0x48] sm:$0xff] }
 0x1d3   :  { %v350_v9 = vmul.f32 0.044715, %v318_v4  ;;  %v348_v10 = vmul.f32 0.044715, %v727_v5  ;;  %v266_v16 = vadd.f32 %v265_v8, %v707_v54  ;;  %v267_v17 = vpop.f32.mrb[3].mxu1  ;;  %v775_v52 = vmul.f32 0.5, %v318_v4 }
 0x1d4   :  { %v351_v11 = vmul.f32 0.044715, %v729_v6  ;;  %v349_v12 = vmul.f32 0.044715, %v731_v7  ;;  %v268_v21 = vadd.f32 %v267_v17, %v709_v55  ;;  %v332_v17 = vmul.f32 0.5, %v727_v5 }
 0x1d5   :  { %v366_v14 = vmul.f32 %v350_v9, %v318_v4  ;;  %v364_v15 = vmul.f32 %v348_v10, %v727_v5  ;;  %v748_v25 = vadd.f32 %v304_v13, %v266_v16  ;;  %v310_v13 = vld [vmem:[%s928_s1 + $0x50] sm:$0xff] }
 0x1d6   :  { %v367_v19 = vmul.f32 %v351_v11, %v729_v6  ;;  %v365_v20 = vmul.f32 %v349_v12, %v731_v7  ;;  %v271_v22 = vpop.f32.mrb[4].mxu1  ;;  %v753_v30 = vadd.f32 %v305_v18, %v268_v21  ;;  %v335_v21 = vmul.f32 0.5, %v729_v6 }
 0x1d7   :  { %v382_v23 = vmul.f32 %v366_v14, %v318_v4  ;;  %v380_v24 = vmul.f32 %v364_v15, %v727_v5  ;;  %v272_v26 = vadd.f32 %v271_v22, %v707_v54  ;;  %v273_v27 = vpop.f32.mrb[5].mxu1  ;;  %v352_v35 = vmul.f32 0.044715, %v748_v25  ;;  %v311_v15 = vld [vmem:[%s928_s1 + $0x58] sm:$0xff] }
 0x1d8   :  { %v383_v28 = vmul.f32 %v367_v19, %v729_v6  ;;  %v381_v29 = vmul.f32 %v365_v20, %v731_v7  ;;  %v274_v32 = vadd.f32 %v273_v27, %v709_v55  ;;  %v353_v39 = vmul.f32 0.044715, %v753_v30 }
 0x1d9   :  { %v398_v33 = vadd.f32 %v382_v23, %v318_v4  ;;  %v396_v34 = vadd.f32 %v380_v24, %v727_v5  ;;  %v368_v43 = vmul.f32 %v352_v35, %v748_v25  ;;  %v768_v44 = vadd.f32 %v306_v31, %v272_v26 }
 0x1da   :  { %v399_v37 = vadd.f32 %v383_v28, %v729_v6  ;;  %v397_v38 = vadd.f32 %v381_v29, %v731_v7  ;;  %v277_v40 = vpop.f32.mrb[6].mxu1  ;;  %v369_v48 = vmul.f32 %v353_v39, %v753_v30  ;;  %v771_v49 = vadd.f32 %v307_v36, %v274_v32 }
 0x1db   :  { %v414_v41 = vmul.f32 0.7978846, %v398_v33  ;;  %v412_v42 = vmul.f32 0.7978846, %v396_v34  ;;  %v279_v45 = vpop.f32.mrb[7].mxu1  ;;  %v384_v50 = vmul.f32 %v368_v43, %v748_v25  ;;  %v278_v61 = vadd.f32 %v277_v40, %v707_v54 }
 0x1dc   :  { %v415_v46 = vmul.f32 0.7978846, %v399_v37  ;;  %v413_v47 = vmul.f32 0.7978846, %v397_v38  ;;  %v354_v51 = vmul.f32 0.044715, %v768_v44  ;;  %v385_v53 = vmul.f32 %v369_v48, %v753_v30 }
 0x1dd   :  { %537 = vtanh.f32 %v414_v41  ;;  %v355_v56 = vmul.f32 0.044715, %v771_v49  ;;  %v400_v59 = vadd.f32 %v384_v50, %v748_v25  ;;  %v280_v2 = vadd.f32 %v279_v45, %v709_v55  ;;  %v312_v37 = vld [vmem:[%s928_s1 + $0x60] sm:$0xff] }
 0x1de   :  { %539 = vtanh.f32 %v415_v46  ;;  %v283_v58 = vpop.f32.mrb[8].mxu1  ;;  %v370_v60 = vmul.f32 %v354_v51, %v768_v44  ;;  %v401_v0 = vadd.f32 %v385_v53, %v753_v30  ;;  %v792_v8 = vadd.f32 %v308_v57, %v278_v61 }
 0x1df   :  { %541 = vtanh.f32 %v412_v42  ;;  %v285_v63 = vpop.f32.mrb[9].mxu1  ;;  %v371_v1 = vmul.f32 %v355_v56, %v771_v49  ;;  %v416_v3 = vmul.f32 0.7978846, %v400_v59  ;;  %v284_v9 = vadd.f32 %v283_v58, %v707_v54 }
 0x1e0   :  { %543 = vtanh.f32 %v413_v47  ;;  %v386_v4 = vmul.f32 %v370_v60, %v768_v44  ;;  %v417_v10 = vmul.f32 0.7978846, %v401_v0  ;;  %v796_v12 = vadd.f32 %v309_v62, %v280_v2  ;;  %v313_v60 = vld [vmem:[%s928_s1 + $0x68] sm:$0xff] }
 0x1e1   :  { %v387_v11 = vmul.f32 %v371_v1, %v771_v49  ;;  %v286_v14 = vadd.f32 %v285_v63, %v709_v55  ;;  %545 = vtanh.f32 %v416_v3  ;;  %v356_v19 = vmul.f32 0.044715, %v792_v8 }
 0x1e2   :  { %v289_v16 = vpop.f32.mrb[10].mxu1  ;;  %v402_v18 = vadd.f32 %v386_v4, %v768_v44  ;;  %547 = vtanh.f32 %v417_v10  ;;  %v357_v23 = vmul.f32 0.044715, %v796_v12  ;;  %v812_v27 = vadd.f32 %v310_v13, %v284_v9 }
 0x1e3   :  { %v291_v20 = vpop.f32.mrb[11].mxu1  ;;  %v403_v22 = vadd.f32 %v387_v11, %v771_v49  ;;  %v372_v26 = vmul.f32 %v356_v19, %v792_v8  ;;  %v814_v28 = vadd.f32 %v311_v15, %v286_v14  ;;  %v333_v5 = vmul.f32 0.5, %v731_v7  ;;  %v314_v11 = vld [vmem:[%s928_s1 + $0x70] sm:$0xff] }
 0x1e4   :  { %v418_v24 = vmul.f32 0.7978846, %v402_v18  ;;  %v373_v31 = vmul.f32 %v357_v23, %v796_v12  ;;  %v290_v32 = vadd.f32 %v289_v16, %v707_v54  ;;  %v336_v34 = vmul.f32 0.5, %v748_v25 }
 0x1e5   :  { %v419_v29 = vmul.f32 0.7978846, %v403_v22  ;;  %v388_v35 = vmul.f32 %v372_v26, %v792_v8  ;;  %v358_v36 = vmul.f32 0.044715, %v812_v27  ;;  %v292_v41 = vadd.f32 %v291_v20, %v709_v55  ;;  %v315_v26 = vld [vmem:[%s928_s1 + $0x78] sm:$0xff] }
 0x1e6   :  { %v295_v6 = vpop.f32.mrb[12].mxu1  ;;  %549 = vtanh.f32 %v418_v24  ;;  %v389_v40 = vmul.f32 %v373_v31, %v796_v12  ;;  %v359_v46 = vmul.f32 0.044715, %v814_v28  ;;  %v832_v53 = vadd.f32 %v312_v37, %v290_v32 }
 0x1e7   :  { %v538_v33 = vpop.eup %537  ;;  %v297_v38 = vpop.f32.mrb[13].mxu1  ;;  %551 = vtanh.f32 %v419_v29  ;;  %v404_v25 = vadd.f32 %v388_v35, %v792_v8  ;;  %v374_v45 = vmul.f32 %v358_v36, %v812_v27  ;;  %v852_v10 = vadd.f32 %v313_v60, %v292_v41 }
 0x1e8   :  { %v540_v7 = vpop.eup %539  ;;  %v446_v39 = vadd.f32 1.0, %v538_v33  ;;  %v405_v51 = vadd.f32 %v389_v40, %v796_v12  ;;  %v375_v63 = vmul.f32 %v359_v46, %v814_v28  ;;  %v360_v3 = vmul.f32 0.044715, %v832_v53 }
 0x1e9   :  { %v542_v42 = vpop.eup %541  ;;  %v447_v43 = vadd.f32 1.0, %v540_v7  ;;  %v420_v58 = vmul.f32 0.7978846, %v404_v25  ;;  %v390_v59 = vmul.f32 %v374_v45, %v812_v27  ;;  %v296_v16 = vadd.f32 %v295_v6, %v707_v54 }
 0x1ea   :  { %v544_v47 = vpop.eup %543  ;;  %v462_v48 = vmul.f32 %v446_v39, %v775_v52  ;;  %v444_v50 = vadd.f32 1.0, %v542_v42  ;;  %v337_v52 = vmul.f32 0.5, %v753_v30  ;;  %v421_v62 = vmul.f32 0.7978846, %v405_v51 }
 0x1eb   :  { %v463_v56 = vmul.f32 %v447_v43, %v335_v21  ;;  %v445_v57 = vadd.f32 1.0, %v544_v47  ;;  %v546_v0 = vpop.eup %545  ;;  %553 = vtanh.f32 %v420_v58  ;;  %v406_v2 = vadd.f32 %v390_v59, %v812_v27 }
 0x1ec   :  { %478 = vst [vmem:[%s929_s5 + $0x10] sm:$0xff] %v462_v48  ;;  %v460_v61 = vmul.f32 %v444_v50, %v332_v17  ;;  %v548_v4 = vpop.eup %547  ;;  %v448_v30 = vadd.f32 1.0, %v546_v0  ;;  %555 = vtanh.f32 %v421_v62  ;;  %v391_v9 = vmul.f32 %v375_v63, %v814_v28 }
 0x1ed   :  { %479 = vst [vmem:[%s929_s5 + $0x18] sm:$0xff] %v463_v56  ;;  %v461_v1 = vmul.f32 %v445_v57, %v333_v5  ;;  %v449_v13 = vadd.f32 1.0, %v548_v4  ;;  %v422_v14 = vmul.f32 0.7978846, %v406_v2  ;;  %v376_v15 = vmul.f32 %v360_v3, %v832_v53 }
 0x1ee   :  { %476 = vst [vmem:[%s929_s5] sm:$0xff] %v460_v61  ;;  %v464_v17 = vmul.f32 %v448_v30, %v336_v34  ;;  %v338_v18 = vmul.f32 0.5, %v768_v44  ;;  %v407_v19 = vadd.f32 %v391_v9, %v814_v28  ;;  %v361_v20 = vmul.f32 0.044715, %v852_v10 }
 0x1ef   :  { %477 = vst [vmem:[%s929_s5 + $0x8] sm:$0xff] %v461_v1  ;;  %v465_v22 = vmul.f32 %v449_v13, %v337_v52  ;;  %557 = vtanh.f32 %v422_v14  ;;  %v392_v23 = vmul.f32 %v376_v15, %v832_v53  ;;  %v866_v24 = vadd.f32 %v314_v11, %v296_v16 }
 0x1f0   :  { %v550_v21 = vpop.eup %549  ;;  %480 = vst [vmem:[%s929_s5 + $0x20] sm:$0xff] %v464_v17  ;;  %v423_v44 = vmul.f32 0.7978846, %v407_v19  ;;  %v377_v29 = vmul.f32 %v361_v20, %v852_v10  ;;  %v298_v31 = vadd.f32 %v297_v38, %v709_v55  ;;  %v339_v32 = vmul.f32 0.5, %v771_v49 }
 0x1f1   :  { %v552_v5 = vpop.eup %551  ;;  %v450_v54 = vadd.f32 1.0, %v550_v21  ;;  %481 = vst [vmem:[%s929_s5 + $0x28] sm:$0xff] %v465_v22  ;;  %v408_v33 = vadd.f32 %v392_v23, %v832_v53  ;;  %v362_v34 = vmul.f32 0.044715, %v866_v24  ;;  %v340_v43 = vmul.f32 0.5, %v792_v8 }
 0x1f2   :  { %v451_v6 = vadd.f32 1.0, %v552_v5  ;;  %559 = vtanh.f32 %v423_v44  ;;  %v393_v36 = vmul.f32 %v377_v29, %v852_v10  ;;  %v331_v37 = vadd.f32 %v315_v26, %v298_v31 }
 0x1f3   :  { %v466_v35 = vmul.f32 %v450_v54, %v338_v18  ;;  %v424_v39 = vmul.f32 0.7978846, %v408_v33  ;;  %v378_v55 = vmul.f32 %v362_v34, %v866_v24  ;;  %v341_v47 = vmul.f32 0.5, %v796_v12 }
 0x1f4   :  { %v467_v7 = vmul.f32 %v451_v6, %v339_v32  ;;  %v409_v49 = vadd.f32 %v393_v36, %v852_v10  ;;  %v363_v38 = vmul.f32 0.044715, %v331_v37  ;;  %v342_v8 = vmul.f32 0.5, %v812_v27 }
 0x1f5   :  { %482 = vst [vmem:[%s929_s5 + $0x30] sm:$0xff] %v466_v35  ;;  %v554_v40 = vpop.eup %553  ;;  %561 = vtanh.f32 %v424_v39  ;;  %v394_v41 = vmul.f32 %v378_v55, %v866_v24  ;;  %v343_v63 = vmul.f32 0.5, %v814_v28  ;;  %v344_v2 = vmul.f32 0.5, %v832_v53 }
 0x1f6   :  { %483 = vst [vmem:[%s929_s5 + $0x38] sm:$0xff] %v467_v7  ;;  %v556_v42 = vpop.eup %555  ;;  %v452_v25 = vadd.f32 1.0, %v554_v40  ;;  %v425_v45 = vmul.f32 0.7978846, %v409_v49  ;;  %v379_v46 = vmul.f32 %v363_v38, %v331_v37  ;;  %v345_v9 = vmul.f32 0.5, %v852_v10 }
 0x1f7   :  { %v453_v48 = vadd.f32 1.0, %v556_v42  ;;  %v410_v50 = vadd.f32 %v394_v41, %v866_v24  ;;  %v346_v14 = vmul.f32 0.5, %v866_v24  ;;  %v347_v17 = vmul.f32 0.5, %v331_v37 }
 0x1f8   :  { %v468_v51 = vmul.f32 %v452_v25, %v340_v43  ;;  %563 = vtanh.f32 %v425_v45  ;;  %v395_v56 = vmul.f32 %v379_v46, %v331_v37 }
 0x1f9   :  { %v558_v57 = vpop.eup %557  ;;  %v469_v58 = vmul.f32 %v453_v48, %v341_v47  ;;  %v426_v59 = vmul.f32 0.7978846, %v410_v50 }
 0x1fa   :  { %484 = vst [vmem:[%s929_s5 + $0x40] sm:$0xff] %v468_v51  ;;  %v454_v60 = vadd.f32 1.0, %v558_v57  ;;  %v411_v61 = vadd.f32 %v395_v56, %v331_v37 }
 0x1fb   :  { %485 = vst [vmem:[%s929_s5 + $0x48] sm:$0xff] %v469_v58  ;;  %565 = vtanh.f32 %v426_v59 }
 0x1fc   :  { %v560_v12 = vpop.eup %559  ;;  %v470_v52 = vmul.f32 %v454_v60, %v342_v8  ;;  %v427_v62 = vmul.f32 0.7978846, %v411_v61 }
 0x1fd   :  { %v455_v0 = vadd.f32 1.0, %v560_v12 }
 0x1fe   :  { %486 = vst [vmem:[%s929_s5 + $0x50] sm:$0xff] %v470_v52  ;;  %567 = vtanh.f32 %v427_v62 }
 0x1ff   :  { %v562_v1 = vpop.eup %561  ;;  %v471_v27 = vmul.f32 %v455_v0, %v343_v63 }
 0x200   :  { %v456_v3 = vadd.f32 1.0, %v562_v1 }
 0x201   :  { %487 = vst [vmem:[%s929_s5 + $0x58] sm:$0xff] %v471_v27 }
 0x202   :  { %v564_v4 = vpop.eup %563  ;;  %v472_v30 = vmul.f32 %v456_v3, %v344_v2 }
 0x203   :  { %v457_v28 = vadd.f32 1.0, %v564_v4 }
 0x204   :  { %488 = vst [vmem:[%s929_s5 + $0x60] sm:$0xff] %v472_v30 }
 0x205   :  { %v566_v11 = vpop.eup %565  ;;  %v473_v13 = vmul.f32 %v457_v28, %v345_v9 }
 0x206   :  { %v458_v15 = vadd.f32 1.0, %v566_v11 }
 0x207   :  { %489 = vst [vmem:[%s929_s5 + $0x68] sm:$0xff] %v473_v13 }
 0x208   :  { %v568_v53 = vpop.eup %567  ;;  %v474_v16 = vmul.f32 %v458_v15, %v346_v14 }
 0x209   :  { %v459_v18 = vadd.f32 1.0, %v568_v53 }
 0x20a   :  { %490 = vst [vmem:[%s929_s5 + $0x70] sm:$0xff] %v474_v16 }
 0x20b   :  { %v475_v10 = vmul.f32 %v459_v18, %v347_v17 }
 0x20d   :  { %491 = vst [vmem:[%s929_s5 + $0x78] sm:$0xff] %v475_v10 }

</bundles_post_ra>
